<compile_context>
chip_gen: v6e
topology: v6e:2x2x1
jax: 0.10.0
libtpu: 0.0.40
codegen_flags: <defaults>
</compile_context>

<pallas_src>
import jax
import jax.numpy as jnp
from jax import lax
from jax.experimental import pallas as pl
from jax.experimental.pallas import tpu as pltpu


def _rmsnorm_kernel(x_ref, g_ref, o_ref):
    # x_ref/o_ref: (Bt, C, Lt), g_ref: (1, C, 1)
    C = x_ref.shape[1]
    x = x_ref[...]
    xf = x.astype(jnp.float32)

    # Sum of squares over channels, accumulated in f32.
    sq = jnp.sum(xf * xf, axis=1, keepdims=True)               # (Bt, 1, Lt)

    # rsqrt(max(sq, 1e-24)) == 1 / max(||x||, 1e-12)  (sqrt is monotone);
    # EUP op on the small per-column vector, no full-tile sqrt/divide.
    inv = lax.rsqrt(jnp.maximum(sq, jnp.float32(1e-24)))
    col = inv * jnp.float32(C ** 0.5)                           # fold sqrt(C) in

    if x.dtype == jnp.bfloat16:
        # Keep big-tile elementwise math in bf16 (native VPU on v6e/v7x,
        # halves vreg/VMEM pressure; on v5e the win is halved HBM bytes).
        out = x * col.astype(x.dtype) * g_ref[...].astype(x.dtype)
    else:
        out = xf * col * g_ref[...].astype(jnp.float32)

    o_ref[...] = out.astype(o_ref.dtype)


def _cdiv(a, b):
    return (a + b - 1) // b


def _round_down_128(n):
    return (n // 128) * 128


def _hw_default_tile_bytes():
    """Generation-aware default tile cap (per review): ~8 MiB on 128 MiB-VMEM
    parts (v5e/v6e), ~5 MiB on 64 MiB parts (v7x). Conservative on unknown."""
    phys = None
    try:
        info = pltpu.get_tpu_info()
        phys = getattr(info, "vmem_capacity_bytes", None)
    except Exception:
        phys = None
    if phys is None:
        return 6 * 1024 * 1024          # safe on every generation
    if phys <= 64 * 1024 * 1024:
        return 5 * 1024 * 1024          # v7x-class (64 MiB physical VMEM)
    return 8 * 1024 * 1024              # v5e / v6e (128 MiB physical VMEM)


def _pick_tiles(B, C, L, itemsize, max_tile_bytes):
    """Choose (Bt, Lt): largest 128-multiple Lt that fits the byte cap (full L
    when L <= 128), then as many batch rows Bt as still fit. Neither needs to
    divide the array extent (grid uses cdiv; edge blocks are masked)."""
    if L <= 128:
        Lt = L                                            # full extent is exempt from the 128 rule
    else:
        lane_budget = max(128, max_tile_bytes // max(1, C * itemsize))
        Lt = max(128, min(_round_down_128(L), _round_down_128(lane_budget)))
    Bt = max(1, min(B, max_tile_bytes // max(1, C * Lt * itemsize)))
    return Bt, Lt


def _ensure_min_grid(B, L, Bt, Lt, min_steps=2):
    """Guarantee >= min_steps grid steps (when possible) so v7x's two
    TensorCores both get work. Split B first (keeps Lt lane-dense)."""
    def n_steps(bt, lt):
        return _cdiv(B, bt) * _cdiv(L, lt)

    while n_steps(Bt, Lt) < min_steps:
        if Bt > 1:
            Bt = _cdiv(Bt, 2)
        elif Lt > 128 and L > 128:
            Lt = max(128, _round_down_128(_cdiv(Lt, 2)))
        else:
            break
    return Bt, Lt


def rmsnorm(x: jax.Array, g: jax.Array, *, max_tile_bytes: int | None = None) -> jax.Array:
    """x: (B, C, L), g: (1, C, 1) -> (B, C, L)."""
    B, C, L = x.shape
    itemsize = jnp.dtype(x.dtype).itemsize

    if max_tile_bytes is None:
        max_tile_bytes = _hw_default_tile_bytes()

    # Budget at the real input itemsize (bf16 buffers really are 2 B/elem).
    Bt, Lt = _pick_tiles(B, C, L, itemsize, max_tile_bytes)
    Bt, Lt = _ensure_min_grid(B, L, Bt, Lt, min_steps=2)

    grid = (_cdiv(B, Bt), _cdiv(L, Lt))

    # Per-step VMEM footprint: double-buffered input + output at the input
    # dtype, plus ~2 f32 tiles of elementwise/reduce intermediates, + margin.
    tile_bytes = Bt * C * Lt * itemsize
    needed = 4 * tile_bytes + 2 * Bt * C * Lt * 4 + (4 << 20)
    vmem_limit = int(max(needed, 32 * 1024 * 1024))

    cost = pl.CostEstimate(
        flops=3 * B * C * L,
        transcendentals=B * L,
        bytes_accessed=2 * B * C * L * itemsize + C * itemsize,
    )

    return pl.pallas_call(
        _rmsnorm_kernel,
        out_shape=jax.ShapeDtypeStruct((B, C, L), x.dtype),
        grid=grid,
        in_specs=[
            pl.BlockSpec((Bt, C, Lt), lambda b, l: (b, 0, l)),
            pl.BlockSpec((1, C, 1), lambda b, l: (0, 0, 0)),
        ],
        out_specs=pl.BlockSpec((Bt, C, Lt), lambda b, l: (b, 0, l)),
        compiler_params=pltpu.CompilerParams(
            dimension_semantics=("parallel", "parallel"),
            vmem_limit_bytes=vmem_limit,
        ),
        cost_estimate=cost,
    )(x, g)


def _ref_rmsnorm(x, g):
    xf = x.astype(jnp.float32)
    norm = jnp.sqrt(jnp.sum(xf * xf, axis=1, keepdims=True))
    out = xf / jnp.maximum(norm, 1e-12) * g.astype(jnp.float32)
    return (out * (x.shape[1] ** 0.5)).astype(x.dtype)


if __name__ == "__main__":
    key = jax.random.PRNGKey(0)
    k1, k2, k3 = jax.random.split(key, 3)

    # Test 1: tiny shape matching the module spec (B, C, L) = (2, 4, 16).
    # Default (large) tile budget; min-grid logic splits B -> grid (2, 1).
    B, C, L = 2, 4, 16
    x = jax.random.normal(k1, (B, C, L), dtype=jnp.float32)
    g = jnp.ones((1, C, 1), dtype=jnp.float32)  # nn.Parameter(torch.ones(1, dim, 1))
    out = rmsnorm(x, g)
    jax.block_until_ready(out)
    assert jnp.allclose(out, _ref_rmsnorm(x, g), atol=1e-5, rtol=1e-5)

    # Test 2: non-128-divisible L with a tiny tile cap -> Lt=128, grid (2, 2),
    # partial (masked) last lane block. Exercises the cdiv/masked-edge path.
    B2, C2, L2 = 2, 8, 200
    x2 = jax.random.normal(k2, (B2, C2, L2), dtype=jnp.float32)
    g2 = 0.5 + jax.random.uniform(k3, (1, C2, 1), dtype=jnp.float32)
    out2 = rmsnorm(x2, g2, max_tile_bytes=C2 * 128 * 4)
    jax.block_until_ready(out2)
    assert jnp.allclose(out2, _ref_rmsnorm(x2, g2), atol=1e-5, rtol=1e-5)

    # Test 3: bf16 streaming path (big-tile math stays in bf16).
    B3, C3, L3 = 2, 8, 256
    x3 = jax.random.normal(k2, (B3, C3, L3), dtype=jnp.bfloat16)
    g3 = jnp.ones((1, C3, 1), dtype=jnp.bfloat16)
    out3 = rmsnorm(x3, g3)
    jax.block_until_ready(out3)
    assert jnp.allclose(out3.astype(jnp.float32),
                        _ref_rmsnorm(x3, g3).astype(jnp.float32),
                        atol=5e-2, rtol=5e-2)

    print("KERNEL_OK")
</pallas_src>

<mosaic_0001>
module attributes {stable_mosaic.version = 11 : i64} {
  func.func @_rmsnorm_kernel(%arg0: i32, %arg1: i32, %arg2: memref<1x4x16xf32, #tpu.memory_space<vmem>>, %arg3: memref<1x4x1xf32, #tpu.memory_space<vmem>>, %arg4: memref<1x4x16xf32, #tpu.memory_space<vmem>>) attributes {dimension_semantics = [#tpu.dimension_semantics<parallel>, #tpu.dimension_semantics<parallel>], iteration_bounds = array<i64: 2, 1>, scalar_prefetch = 0 : i64, scratch_operands = 0 : i64, tpu.core_type = #tpu.core_type<tc>, window_params = [{transform_indices = @transform_0, window_bounds = array<i64: 1, 4, 16>}, {pipeline_mode = #tpu.pipeline_mode<synchronous>, transform_indices = @transform_1, window_bounds = array<i64: 1, 4, 1>}, {transform_indices = @transform_2, window_bounds = array<i64: 1, 4, 16>}]} {
    %c0 = arith.constant 0 : index
    %c0_0 = arith.constant 0 : index
    %c0_1 = arith.constant 0 : index
    %0 = vector.load %arg2[%c0, %c0_0, %c0_1] : memref<1x4x16xf32, #tpu.memory_space<vmem>>, vector<1x4x16xf32>
    %1 = arith.mulf %0, %0 : vector<1x4x16xf32>
    %cst = arith.constant dense<0.000000e+00> : vector<1x16xf32>
    %2 = vector.multi_reduction <add>, %1, %cst [1] : vector<1x4x16xf32> to vector<1x16xf32>
    %3 = vector.shape_cast %2 : vector<1x16xf32> to vector<1x1x16xf32>
    %cst_2 = arith.constant 1.000000e-24 : f32
    %4 = vector.broadcast %cst_2 : f32 to vector<1x1x16xf32>
    %5 = arith.maximumf %3, %4 : vector<1x1x16xf32>
    %6 = math.rsqrt %5 : vector<1x1x16xf32>
    %cst_3 = arith.constant 2.000000e+00 : f32
    %7 = vector.broadcast %cst_3 : f32 to vector<1x1x16xf32>
    %8 = arith.mulf %6, %7 : vector<1x1x16xf32>
    %9 = vector.broadcast %8 : vector<1x1x16xf32> to vector<1x4x16xf32>
    %10 = arith.mulf %0, %9 : vector<1x4x16xf32>
    %c0_4 = arith.constant 0 : index
    %c0_5 = arith.constant 0 : index
    %c0_6 = arith.constant 0 : index
    %11 = vector.load %arg3[%c0_4, %c0_5, %c0_6] : memref<1x4x1xf32, #tpu.memory_space<vmem>>, vector<1x4x1xf32>
    %12 = vector.broadcast %11 : vector<1x4x1xf32> to vector<1x4x16xf32>
    %13 = arith.mulf %10, %12 : vector<1x4x16xf32>
    %c0_7 = arith.constant 0 : index
    %c0_8 = arith.constant 0 : index
    %c0_9 = arith.constant 0 : index
    %14 = vector.load %arg4[%c0_7, %c0_8, %c0_9] : memref<1x4x16xf32, #tpu.memory_space<vmem>>, vector<1x4x16xf32>
    tpu.vector_store %arg4[%c0_7, %c0_8, %c0_9], %13 {strides = array<i32>} : memref<1x4x16xf32, #tpu.memory_space<vmem>>, vector<1x4x16xf32>,
    return
  }
  func.func @transform_0(%arg0: i32, %arg1: i32) -> (i32, i32, i32) {
    %c0_i32 = arith.constant 0 : i32
    %c0_i32_0 = arith.constant 0 : i32
    return %arg0, %c0_i32, %arg1 : i32, i32, i32
  }
  func.func @transform_1(%arg0: i32, %arg1: i32) -> (i32, i32, i32) {
    %c0_i32 = arith.constant 0 : i32
    %c0_i32_0 = arith.constant 0 : i32
    %c0_i32_1 = arith.constant 0 : i32
    %c0_i32_2 = arith.constant 0 : i32
    return %c0_i32, %c0_i32_0, %c0_i32_1 : i32, i32, i32
  }
  func.func @transform_2(%arg0: i32, %arg1: i32) -> (i32, i32, i32) {
    %c0_i32 = arith.constant 0 : i32
    %c0_i32_0 = arith.constant 0 : i32
    return %arg0, %c0_i32, %arg1 : i32, i32, i32
  }
}

</mosaic_0001>

<bundles_post_ra>
// kernel: tpu_custom_call.1
= control target key start
LH: loop header
LB: loop body
LE: loop exit
PB: predicated region body
PF: predicated region fallthrough
CT: control target
= control target key end

     0   :  { %7 = vsyncpa [#allocation3], 0  ;;  %s639_s0 = inlined_call_operand.hbm [shape: f32[2,4,16], index: 0, kind: input, shape index: {}]   ;;  %s640_s1 = inlined_call_operand.vmem [shape: f32[1,4,1], index: 1, kind: input, shape index: {}]   ;;  %s641_s2 = inlined_call_operand.hbm [shape: f32[2,4,16], index: 2, kind: output, shape index: {}]  }
   0x1   :  { %9 = vsyncpa [#allocation3 + $0x1], 0 }
   0x2   :  { %10 = vsyncpa [#allocation4], 0 }
   0x3   :  { %12 = vsyncpa [#allocation4 + $0x1], 0  ;;  %s500_s9 = smov 0   ;;  %s502_s10 = smov 0  }
   0x4   :  { %s504_s11 = smov 0   ;;  %s506_s12 = smov 0  }
   0x5   :  { %s508_s13 = smov 0   ;;  %s510_s14 = smov 0  }
   0x6 LB: > { %s293_s15 = sadd.s32 4294967295, %s480_s14   ;;  %s294_s16 = sadd.s32 4294967294, %s480_s14   ;;  %s480_s14 = sphi %s510_s14, %s18_s14   ;;  %s476_s13 = sphi %s508_s13, %s653_s13   ;;  %s472_s12 = sphi %s506_s12, %s652_s12   ;;  %s468_s11 = sphi %s504_s11, %s651_s11   ;;  %s464_s10 = sphi %s502_s10, %s650_s10   ;;  %s460_s9 = sphi %s500_s9, %s649_s9  }
   0x7   : > { %s30_s17 = sadd.s32 1, %s476_s13  ;;  %s39_s18 = sadd.s32 1, %s468_s11 }
   0x8   : > { %p32_p0 = scmp.ge.s32.totalorder %s30_s17, 2  ;;  %p46_p1 = scmp.ne.s32.totalorder %s468_s11, %s464_s10 }
   0x9   : > { %p47_p2 = scmp.eq.s32.totalorder %s480_s14, 0  ;;  %p52_p3 = scmp.ne.s32.totalorder %s464_s10, %s460_s9 }
   0xa   : > { %s655_s17 = smov (%p32_p0, %s30_s17), 0  ;;  %p53_p5 = scmp.eq.s32.totalorder %s293_s15, 0 }
   0xb   : > { %p541_p4 = por %p47_p2, %p46_p1  ;;  %s34_s20 = ssub.s32 %s476_s13, %s655_s17 }
   0xc   : > { %p99_p6 = scmp.eq.s32.totalorder %s293_s15, 1  ;;  %p37_p7 = scmp.eq.s32.totalorder %s34_s20, 0 }
   0xd   : > { %p547_p8 = por %p53_p5, %p52_p3  ;;  %p105_p10 = scmp.eq.s32.totalorder %s294_s16, 1 }
   0xe   : > { %p551_p9 = por %p99_p6, %p46_p1  ;;  %p318_p13 = scmp.lt.s32.totalorder %s480_s14, 2 }
   0xf   : > { %s556_s23 = scalar_select %p37_p7, %s468_s11, %s39_s18  }
  0x10   : > { %p558_p11 = por %p105_p10, %p52_p3  ;;  %s128_s25 = sand.u32 1, %s468_s11  }
  0x11   : > { %s297_s26 = sshll.u32 %s128_s25, 2  ;;  %s298_s27 = sshll.u32 %s476_s13, 6 }
  0x12   : > { %s645_s24 = scalar_select %p558_p11, 1, 0 }
  0x13   : > { %s138_s30 = scalar_lea.hbm %s639_s0, %s298_s27  ;;  %s132_s3 = scalar_lea.vmem [#allocation2], %s297_s26 }
  0x14   : > { %s140_s4 = sshll.u32 %s132_s3, 4  ;;  %p571_p0 = pnand %p318_p13, %p541_p4  ;;  %s141_s4 = int_to_ptr.vmem [resolvable:$true] %s140_s4 }
  0x15   : > { %p299_p1 = scmp.ge.s32.totalorder %s480_s14, 1  ;;  %p145_p2 = scmp.lt.s32.totalorder %s480_s14, 3 }
  0x16   : > { %s129_s6 = scalar_lea.sflag [#allocation3], %s128_s25  ;;  %p374_p3 = pneg %p571_p0 }
  0x17   : > { %s385_s7 = scalar_lea.vmem %s141_s4, 64  ;;  %s482_s8 = smov [#allocation2]  }
  0x18   : > { %p386_p5 = scmp.ne.s32.totalorder %s141_s4, %s385_s7  ;;  %s390_s15 = sshll.u32 %s482_s8, 4  ;;  %s391_s15 = int_to_ptr.vmem [resolvable:$false] %s390_s15 }
  0x19   : > { %s392_s16 = scalar_lea.vmem %s391_s15, 128  ;;  %p393_p10 = scmp.lt.s32.totalorder %s141_s4, %s391_s15 }
  0x1a   : > { %p388_p6 = pnand %p386_p5, %p374_p3  ;;  %p394_p12 = scmp.lt.s32.totalorder %s392_s16, %s385_s7 }
  0x1c   : > { %p389_p7 = pneg %p388_p6  ;;  %p395_p4 = por %p394_p12, %p393_p10 }
  0x1e   : > { %p396_p13 = pnand %p395_p4, %p389_p7 }
  0x20   : > { %399 = shalt.err (!%p396_p13)
}
  0x21   : > { %313 = dma.hbm_to_vmem [thread:$0]  (!%p571_p0), %s138_s30, 64, %s141_s4, %s129_s6  }
  0x22   : > { %p146_p11 = pnand %p299_p1, %p145_p2 }
  0x23   : > { %s586_s18 = sand.u32 (!%p146_p11), 1, %s464_s10  }
  0x24   : > { %149 = sbr.rel (%p146_p11) target bundleno = 183 (0xb7), region = 28  ;;  %s300_s19 = sshll.u32 (!%p146_p11), %s586_s18, 2 }
  0x25   : > { %s152_s20 = scalar_lea.sflag (!%p146_p11), [#allocation3], %s586_s18  ;;  %s155_s25 = scalar_lea.vmem (!%p146_p11), [#allocation2], %s300_s19 }
  0x29   : > { %451 = dma.done.wait (%p547_p8), %s152_s20, 64  }
  0x2a   : > { %453 = vsyncadd (%p547_p8), %s152_s20, 4294967232  ;;  %v483_v0 = vmov 0   ;;  %v190_v1 = vld [vmem:[%s640_s1] sm:$0xf]  ;;  %vm178_vm0 = vcmask 125952   ;;  %s303_s21 = sshll.u32 %s472_s12, 6 }
  0x2b   : > { %369 = vset.pattern.permute.xlu0 %v483_v0  ;;  %v176_v2 = vld [vmem:[%s155_s25] sm:$0xf]  ;;  %s175_s28 = scalar_lea.vmem [#allocation5], %s300_s19  ;;  %s211_s4 = scalar_lea.hbm %s641_s2, %s303_s21 }
  0x2c   : > { %193 = vperm.xlu0 %369, %v190_v1   ;;  %v177_v3 = vmul.f32 %v176_v2, %v176_v2  ;;  %s213_s29 = sshll.u32 %s175_s28, 4  ;;  %s199_s5 = scalar_lea.sflag [#allocation4], %s586_s18  ;;  %s214_s29 = int_to_ptr.vmem [resolvable:$true] %s213_s29 }
  0x2d   : > { %s400_s6 = scalar_lea.vmem %s214_s29, 64  ;;  %s484_s7 = smov [#allocation5]  }
  0x2e   : > { %v179_v4 = vsel %vm178_vm0, %v177_v3, 0.0  ;;  %p401_p8 = scmp.ne.s32.totalorder %s214_s29, %s400_s6  ;;  %s404_s8 = sshll.u32 %s484_s7, 4  ;;  %s405_s8 = int_to_ptr.vmem [resolvable:$false] %s404_s8 }
  0x2f   : > { %v180_v5 = vrot.slane %v179_v4, 4  ;;  %s406_s12 = scalar_lea.vmem %s405_s8, 128  ;;  %p407_p0 = scmp.lt.s32.totalorder %s214_s29, %s405_s8 }
  0x30   : > { %p402_p11 = pnand %p401_p8, %p551_p9  ;;  %p408_p1 = scmp.lt.s32.totalorder %s406_s12, %s400_s6 }
  0x31   : > { %v181_v6 = vadd.f32 %v180_v5, %v179_v4 }
  0x32   : > { %p403_p12 = pneg %p402_p11  ;;  %p409_p2 = por %p408_p1, %p407_p0 }
  0x33   : > { %v182_v7 = vrot.slane %v181_v6, 2 }
  0x34   : > { %p410_p3 = pnand %p409_p2, %p403_p12 }
  0x35   : > { %v183_v8 = vadd.f32 %v182_v7, %v181_v6 }
  0x37   : > { %v184_v9 = vrot.slane %v183_v8, 1 }
  0x39   : > { %v185_v10 = vadd.f32 %v184_v9, %v183_v8 }
  0x3b   : > { %v186_v11 = vmax.f32 %v185_v10, 1e-24 }
  0x3d   : > { %370 = vrsqrt.f32 %v186_v11 }
  0x4a   : > { %v371_v12 = vpop.eup %370 }
  0x4b   : > { %v188_v13 = vmul.f32 2.0, %v371_v12 }
  0x4d   : > { %v189_v14 = vmul.f32 %v188_v13, %v176_v2 }
  0xa7   : > { %v194_v15 = vpop.permute.xlu0 %193 }
  0xa8   : > { %v196_v16 = vmul.f32 %v194_v15, %v189_v14 }
  0xaa   : > { %197 = vst.msk [vmem:[%s175_s28] sm:$0xf] %vm178_vm0, %v196_v16 }
  0xab   : > { %413 = shalt.err (!%p410_p3)
}
  0xac   : > { %s414_s15 = scalar_lea.hbm %s211_s4, 64  ;;  %s418_s19 = scalar_lea.hbm %s641_s2, 128 }
  0xad   : > { %p415_p5 = scmp.ne.s32.totalorder %s211_s4, %s414_s15  ;;  %p419_p10 = scmp.lt.s32.totalorder %s211_s4, %s641_s2 }
  0xae   : > { %p420_p4 = scmp.lt.s32.totalorder %s418_s19, %s414_s15 }
  0xaf   : > { %p416_p6 = pnand %p415_p5, %p551_p9 }
  0xb0   : > { %p421_p13 = por %p420_p4, %p419_p10 }
  0xb1   : > { %p417_p7 = pneg %p416_p6 }
  0xb3   : > { %p422_p8 = pnand %p421_p13, %p417_p7 }
  0xb5   : > { %425 = shalt.err (!%p422_p8)
}
  0xb6   : > { %308 = dma.vmem_to_hbm [thread:$0]  (%p551_p9), %s214_s29, 64, %s211_s4, %s199_s5  }
  0xb7 PF: > { %s225_s26 = sand.u32 1, %s460_s9   ;;  %p647_p11 = scmp.ne.s32.totalorder %s645_s24, 0 }
  0xb8   : > { %p648_p12 = scmp.ge.s32.totalorder %s480_s14, 2  ;;  %s226_s27 = scalar_lea.sflag [#allocation4], %s225_s26 }
  0xba   : > { %p315_p0 = pnand %p648_p12, %p647_p11 }
  0xbc   : > { %p316_p1 = pneg %p315_p0 }
  0xbe   : > { %455 = dma.done.wait (%p316_p1), %s226_s27, 64  }
  0xbf   : > { %457 = vsyncadd (%p316_p1), %s226_s27, 4294967232  ;;  %s18_s14 = sadd.s32 1, %s480_s14   ;;  %s649_s9 = smov %s464_s10 }
  0xc0   : > { %p15_p2 = scmp.ge.s32.totalorder %s18_s14, 4   ;;  %s650_s10 = smov %s468_s11 }
  0xc1   : > { %s651_s11 = smov %s556_s23  ;;  %s652_s12 = smov %s476_s13 }
  0xc2   : > { %s653_s13 = smov %s655_s17  ;;  %17 = sbr.rel (!%p15_p2) target bundleno = 6 (0x6), region = 73 }
  0xc7   :  { %231 = vsyncpa [#allocation3], 1 }
  0xc8   :  { %233 = vsyncpa [#allocation3 + $0x1], 1 }
  0xc9   :  { %234 = vsyncpa [#allocation4], 1 }
  0xca   :  { %236 = vsyncpa [#allocation4 + $0x1], 1 }

</bundles_post_ra>
